<compile_context>
chip_gen: v6e
topology: v6e:2x2x1
jax: 0.10.0
libtpu: 0.0.40
codegen_flags: <defaults>
</compile_context>

<pallas_src>
import math

import jax
import jax.numpy as jnp
from jax.experimental import pallas as pl
from jax.experimental.pallas import tpu as pltpu


# ----------------------------------------------------------------------------
# Pallas kernel: fused conv-as-matmul (transposed) + folded-BN bias + ReLU6
# ----------------------------------------------------------------------------
def _conv1_bn_relu6_kernel(a_ref, w_ref, b_ref, o_ref):
    # a_ref: (9, L)      nine stride-2 conv taps for this spatial tile
    # w_ref: (Cout, 9)   conv weights with the BN scale folded in
    # b_ref: (Cout, 1)   folded BN bias
    # o_ref: (Cout, L)   output tile (channels on sublanes, spatial on lanes)
    acc = jnp.dot(w_ref[...], a_ref[...],
                  precision=jax.lax.Precision.HIGHEST,
                  preferred_element_type=jnp.float32)          # (Cout, L)
    o_ref[...] = jnp.clip(acc + b_ref[...], 0.0, 6.0).astype(o_ref.dtype)


# ----------------------------------------------------------------------------
# Tiling / VMEM-budget helpers
# ----------------------------------------------------------------------------
def _vmem_budget_bytes():
    """Generation-aware scratch budget (~3/8 of physical VMEM)."""
    try:
        cap = pltpu.get_tpu_info().vmem_capacity_bytes
    except Exception:
        cap = 128 * 1024 * 1024        # v5e/v6e physical; safe fallback
    return max(8 * 1024 * 1024, (cap * 3) // 8)   # ~48 MiB v5e/v6e, ~24 MiB v7x


def _choose_tiling(n, m0, cout, budget_bytes):
    """Pick lane tile L (multiple of 128) and padded spatial size M = n_t * L.

    Per-lane f32 footprint: double-buffered output (2*cout) + double-buffered
    tap tile padded 9->16 sublanes (2*16) + in-kernel accumulator/intermediate
    copies (~2*cout).
    """
    per_lane = 4 * (4 * cout + 2 * 16)
    m128 = ((m0 + 127) // 128) * 128
    q = m128 // 128                                   # 128-lane chunks
    l_cap_chunks = max(1, budget_bytes // (per_lane * 128))
    n_t = max(1, math.ceil(q / l_cap_chunks))
    # v7x megacore: keep >= 4 grid steps (batch x tiles) when the tensor allows.
    n_t = max(n_t, min(q, math.ceil(4 / max(1, n))))
    l = math.ceil(q / n_t) * 128
    m_padded = n_t * l
    return l, n_t, m_padded


# ----------------------------------------------------------------------------
# pallas_call wrapper
# ----------------------------------------------------------------------------
def _fused_conv_bn_relu6(taps, w_mat, bias, *, n, n_t, cout, l, m_padded,
                         vmem_limit, out_dtype=jnp.float32):
    return pl.pallas_call(
        _conv1_bn_relu6_kernel,
        out_shape=jax.ShapeDtypeStruct((n, cout, m_padded), out_dtype),
        grid_spec=pltpu.PrefetchScalarGridSpec(
            num_scalar_prefetch=0,
            grid=(n, n_t),
            in_specs=[
                pl.BlockSpec((None, 9, l), lambda i, t: (i, 0, t)),
                pl.BlockSpec((cout, 9), lambda i, t: (0, 0)),
                pl.BlockSpec((cout, 1), lambda i, t: (0, 0)),
            ],
            out_specs=pl.BlockSpec((None, cout, l), lambda i, t: (i, 0, t)),
        ),
        compiler_params=pltpu.CompilerParams(
            dimension_semantics=("parallel", "parallel"),
            vmem_limit_bytes=int(vmem_limit)),
    )(taps, w_mat, bias)


# ----------------------------------------------------------------------------
# Module wrapper (eval-mode BatchNorm, as in PyTorch .eval() / running stats)
# ----------------------------------------------------------------------------
def simulated_conv1_forward(x_nchw, params, *, eps=1e-5, out_dtype=jnp.float32):
    """x_nchw: (N, 1, H, W) float32 -> (N, Cout, OH, OW).

    Conv2d(k=3, s=2, p=1, bias=False) + BatchNorm2d (eval-mode running stats)
    + ReLU6, matching the PyTorch SimulatedConv1 forward.
    """
    w = params["conv_weight"]           # (Cout, 1, 3, 3)
    gamma = params["bn_weight"]         # (Cout,)
    beta = params["bn_bias"]            # (Cout,)
    r_mean = params["bn_running_mean"]  # (Cout,)
    r_var = params["bn_running_var"]    # (Cout,)

    n, cin, h, wd = x_nchw.shape
    assert cin == 1
    cout = w.shape[0]
    oh = (h - 1) // 2 + 1
    ow = (wd - 1) // 2 + 1
    m0 = oh * ow

    # ---- glue: fold eval-mode BN into conv weights / bias ----
    scale = gamma / jnp.sqrt(r_var + eps)                              # (Cout,)
    w_mat = (w.reshape(cout, 9) * scale[:, None]).astype(jnp.float32)  # (Cout, 9)
    bias = (beta - r_mean * scale).astype(jnp.float32).reshape(cout, 1)

    # ---- tiling (lane-dense, VMEM-budgeted, generation-aware) ----
    budget = _vmem_budget_bytes()
    l, n_t, m_padded = _choose_tiling(n, m0, cout, budget)

    # ---- glue: stride-2 space-to-depth -> nine tap planes, flattened ----
    # Tap index k = ky*3 + kx matches conv_weight.reshape(Cout, 9) ordering.
    xp = jnp.pad(x_nchw[:, 0].astype(jnp.float32),
                 ((0, 0), (1, 2 * oh - h), (1, 2 * ow - wd)))
    taps = jnp.stack([xp[:, ky:ky + 2 * oh:2, kx:kx + 2 * ow:2]
                      for ky in range(3) for kx in range(3)], axis=1)  # (N,9,OH,OW)
    taps = taps.reshape(n, 9, m0)                                      # free reshape
    if m_padded != m0:
        taps = jnp.pad(taps, ((0, 0), (0, 0), (0, m_padded - m0)))

    out = _fused_conv_bn_relu6(taps, w_mat, bias, n=n, n_t=n_t, cout=cout,
                               l=l, m_padded=m_padded, vmem_limit=budget,
                               out_dtype=out_dtype)
    if m_padded != m0:
        out = out[:, :, :m0]
    return out.reshape(n, cout, oh, ow)   # free row-major reshape to NCHW


# ----------------------------------------------------------------------------
# Params + reference
# ----------------------------------------------------------------------------
def init_params(key, out_channels=32):
    k_w, k_g, k_b, k_m, k_v = jax.random.split(key, 5)
    conv_weight = jax.random.normal(k_w, (out_channels, 1, 3, 3),
                                    jnp.float32) * (2.0 / 9.0) ** 0.5
    bn_weight = 1.0 + 0.1 * jax.random.normal(k_g, (out_channels,), jnp.float32)
    bn_bias = 0.1 * jax.random.normal(k_b, (out_channels,), jnp.float32)
    bn_running_mean = 0.05 * jax.random.normal(k_m, (out_channels,), jnp.float32)
    bn_running_var = 1.0 + 0.1 * jnp.abs(
        jax.random.normal(k_v, (out_channels,), jnp.float32))
    return dict(conv_weight=conv_weight, bn_weight=bn_weight, bn_bias=bn_bias,
                bn_running_mean=bn_running_mean, bn_running_var=bn_running_var)


def _reference_forward(x_nchw, params, eps=1e-5):
    y = jax.lax.conv_general_dilated(
        x_nchw, params["conv_weight"], window_strides=(2, 2),
        padding=((1, 1), (1, 1)), dimension_numbers=("NCHW", "OIHW", "NCHW"),
        precision=jax.lax.Precision.HIGHEST)
    scale = params["bn_weight"] / jnp.sqrt(params["bn_running_var"] + eps)
    bias = params["bn_bias"] - params["bn_running_mean"] * scale
    y = y * scale[None, :, None, None] + bias[None, :, None, None]
    return jnp.clip(y, 0.0, 6.0)


if __name__ == "__main__":
    key = jax.random.PRNGKey(0)
    k_x, k_p = jax.random.split(key)

    # Small shapes consistent with the module: batch=2, 1 channel, 16x16 "image".
    x = jax.random.normal(k_x, (2, 1, 16, 16), jnp.float32)
    params = init_params(k_p, out_channels=32)

    fwd = jax.jit(lambda xx, pp: simulated_conv1_forward(xx, pp))
    out = jax.block_until_ready(fwd(x, params))

    ref = _reference_forward(x, params)
    assert out.shape == (2, 32, 8, 8), out.shape
    max_err = float(jnp.max(jnp.abs(out - ref)))
    assert jnp.allclose(out, ref, atol=2e-4, rtol=2e-4), max_err

    print("KERNEL_OK")
</pallas_src>

<mosaic_0001>
module attributes {stable_mosaic.version = 11 : i64} {
  func.func @_conv1_bn_relu6_kernel(%arg0: i32, %arg1: i32, %arg2: memref<1x9x128xf32, #tpu.memory_space<vmem>>, %arg3: memref<32x9xf32, #tpu.memory_space<vmem>>, %arg4: memref<32x1xf32, #tpu.memory_space<vmem>>, %arg5: memref<1x32x128xf32, #tpu.memory_space<vmem>>) attributes {dimension_semantics = [#tpu.dimension_semantics<parallel>, #tpu.dimension_semantics<parallel>], iteration_bounds = array<i64: 2, 1>, scalar_prefetch = 0 : i64, scratch_operands = 0 : i64, tpu.core_type = #tpu.core_type<tc>, window_params = [{transform_indices = @transform_0, window_bounds = array<i64: 1, 9, 128>}, {pipeline_mode = #tpu.pipeline_mode<synchronous>, transform_indices = @transform_1, window_bounds = array<i64: 32, 9>}, {pipeline_mode = #tpu.pipeline_mode<synchronous>, transform_indices = @transform_2, window_bounds = array<i64: 32, 1>}, {transform_indices = @transform_3, window_bounds = array<i64: 1, 32, 128>}]} {
    %c0 = arith.constant 0 : index
    %c0_0 = arith.constant 0 : index
    %0 = vector.load %arg3[%c0, %c0_0] : memref<32x9xf32, #tpu.memory_space<vmem>>, vector<32x9xf32>
    %c0_1 = arith.constant 0 : index
    %c0_2 = arith.constant 0 : index
    %c0_3 = arith.constant 0 : index
    %1 = vector.load %arg2[%c0_1, %c0_2, %c0_3] : memref<1x9x128xf32, #tpu.memory_space<vmem>>, vector<1x9x128xf32>
    %2 = vector.shape_cast %1 : vector<1x9x128xf32> to vector<9x128xf32>
    %cst = arith.constant dense<0.000000e+00> : vector<32x128xf32>
    %3 = tpu.matmul %0, %2, %cst {dimension_numbers = #tpu.dot_dimension_numbers<[1], [0], [0], [1], [0, 0, 1, 1], [], []>, precision = #tpu.contract_precision<fp32>} : vector<32x9xf32>, vector<9x128xf32>, vector<32x128xf32> -> vector<32x128xf32>
    %c0_4 = arith.constant 0 : index
    %c0_5 = arith.constant 0 : index
    %4 = vector.load %arg4[%c0_4, %c0_5] : memref<32x1xf32, #tpu.memory_space<vmem>>, vector<32x1xf32>
    %5 = vector.broadcast %4 : vector<32x1xf32> to vector<32x128xf32>
    %6 = arith.addf %3, %5 : vector<32x128xf32>
    %cst_6 = arith.constant 0.000000e+00 : f32
    %cst_7 = arith.constant 6.000000e+00 : f32
    %7 = vector.broadcast %cst_6 : f32 to vector<32x128xf32>
    %8 = arith.maximumf %7, %6 : vector<32x128xf32>
    %9 = vector.broadcast %cst_7 : f32 to vector<32x128xf32>
    %10 = arith.minimumf %9, %8 : vector<32x128xf32>
    %c0_8 = arith.constant 0 : index
    %c0_9 = arith.constant 0 : index
    %c0_10 = arith.constant 0 : index
    %11 = vector.load %arg5[%c0_8, %c0_9, %c0_10] : memref<1x32x128xf32, #tpu.memory_space<vmem>>, vector<1x32x128xf32>
    %12 = vector.shape_cast %11 : vector<1x32x128xf32> to vector<32x128xf32>
    %13 = vector.shape_cast %10 : vector<32x128xf32> to vector<1x32x128xf32>
    tpu.vector_store %arg5[%c0_8, %c0_9, %c0_10], %13 {strides = array<i32>} : memref<1x32x128xf32, #tpu.memory_space<vmem>>, vector<1x32x128xf32>,
    return
  }
  func.func @transform_0(%arg0: i32, %arg1: i32) -> (i32, i32, i32) {
    %c0_i32 = arith.constant 0 : i32
    %c0_i32_0 = arith.constant 0 : i32
    return %arg0, %c0_i32, %arg1 : i32, i32, i32
  }
  func.func @transform_1(%arg0: i32, %arg1: i32) -> (i32, i32) {
    %c0_i32 = arith.constant 0 : i32
    %c0_i32_0 = arith.constant 0 : i32
    %c0_i32_1 = arith.constant 0 : i32
    return %c0_i32, %c0_i32_0 : i32, i32
  }
  func.func @transform_2(%arg0: i32, %arg1: i32) -> (i32, i32) {
    %c0_i32 = arith.constant 0 : i32
    %c0_i32_0 = arith.constant 0 : i32
    %c0_i32_1 = arith.constant 0 : i32
    return %c0_i32, %c0_i32_0 : i32, i32
  }
  func.func @transform_3(%arg0: i32, %arg1: i32) -> (i32, i32, i32) {
    %c0_i32 = arith.constant 0 : i32
    %c0_i32_0 = arith.constant 0 : i32
    return %arg0, %c0_i32, %arg1 : i32, i32, i32
  }
}

</mosaic_0001>

<bundles_post_ra>
// kernel: _lambda_.1
= control target key start
LH: loop header
LB: loop body
LE: loop exit
PB: predicated region body
PF: predicated region fallthrough
CT: control target
= control target key end

     0   :  { %s1113_s12 = smov 0   ;;  %s1115_s13 = smov 0   ;;  %s1218_s0 = inlined_call_operand.vmem [shape: f32[2,9,128], index: 0, kind: input, shape index: {}]   ;;  %s1219_s1 = inlined_call_operand.vmem [shape: f32[32,9], index: 1, kind: input, shape index: {}]   ;;  %s1220_s2 = inlined_call_operand.vmem [shape: f32[32,1], index: 2, kind: input, shape index: {}]   ;;  %s1221_s3 = inlined_call_operand.vmem [shape: f32[2,32,128], index: 3, kind: output, shape index: {}]  }
   0x1   :  { %s1117_s14 = smov 0  }
   0x2 LB: > { %s25_s15 = sadd.s32 1, %s1086_s13  ;;  %p936_p0 = scmp.ge.s32.totalorder %s1090_s14, 1  ;;  %s1090_s14 = sphi %s1117_s14, %s13_s14   ;;  %s1086_s13 = sphi %s1115_s13, %s1223_s13   ;;  %s1082_s12 = sphi %s1113_s12, %s1222_s12  }
   0x3   : > { %p27_p1 = scmp.ge.s32.totalorder %s25_s15, 2  ;;  %p156_p2 = scmp.lt.s32.totalorder %s1090_s14, 3 }
   0x5   : > { %s1225_s15 = smov (%p27_p1, %s25_s15), 0  ;;  %p157_p3 = pnand %p936_p0, %p156_p2 }
   0x6   : > { %p186_p4 = scmp.lt.s32.totalorder (!%p157_p3), %s1082_s12, 1 }
   0x7   : > { %160 = sbr.rel (%p157_p3) target bundleno = 254 (0xfe), region = 32 }
   0xc   : > { %v202_v0 = vld [vmem:[%s1219_s1] sm:$0xff]  ;;  %vm232_vm0 = vcmask 72704   ;;  %v203_v1 = vld [vmem:[%s1219_s1 + $0x8] sm:$0xff]  ;;  %v204_v2 = vld [vmem:[%s1219_s1 + $0x10] sm:$0xff]  ;;  %s1227_s12 = smov (!%p186_p4, %s1082_s12), 1  ;;  %v1092_v12 = vmov 0  }
   0xd   : > { %v234_v3 = vsel %vm232_vm0, %v202_v0, 0  ;;  %v237_v4 = vsel %vm232_vm0, %v203_v1, 0  ;;  %v240_v5 = vsel %vm232_vm0, %v204_v2, 0  ;;  %v205_v6 = vld [vmem:[%s1219_s1 + $0x18] sm:$0xff]  ;;  %v208_v7 = vld [vmem:[%s1220_s2] sm:$0xff]  ;;  %1066 = vset.pattern.permute.xlu0 %v1092_v12  ;;  %1067 = vset.pattern.permute.xlu1 %v1092_v12  ;;  %v210_v13 = vld [vmem:[%s1220_s2 + $0x10] sm:$0xff] }
   0xe   : > { %v1148_v8 = vand.u32 4294901760, %v234_v3  ;;  %v1150_v9 = vand.u32 4294901760, %v237_v4  ;;  %v1152_v10 = vand.u32 4294901760, %v240_v5  ;;  %v243_v11 = vsel %vm232_vm0, %v205_v6, 0  ;;  %214 = vperm.xlu0 %1066, %v208_v7   ;;  %224 = vperm.xlu1 %1067, %v210_v13   ;;  %s943_s28 = sshll.u32 %s1227_s12, 4  ;;  %v209_v18 = vld [vmem:[%s1220_s2 + $0x8] sm:$0xff] }
   0xf   : > { %v1157_v14 = vand.u32 4294901760, %v243_v11  ;;  %vm245_vm1 = vcmask 1040384   ;;  %v211_v19 = vld [vmem:[%s1220_s2 + $0x18] sm:$0xff]  ;;  %s193_s8 = scalar_lea.vmem %s1218_s0, %s943_s28  ;;  %s944_s9 = sshll.u32 %s1227_s12, 5 }
  0x10   : > { %v1161_v15 = vsub.f32 %v234_v3, %v1148_v8  ;;  %v1164_v16 = vsub.f32 %v237_v4, %v1150_v9  ;;  %v1167_v17 = vsub.f32 %v240_v5, %v1152_v10  ;;  %995 = vmatprep.mubr.f32.mxu1 %v1148_v8  ;;  %v207_v21 = vld [vmem:[%s193_s8 + $0x8] sm:$0x1]  ;;  %v206_v22 = vld [vmem:[%s193_s8] sm:$0xff]  ;;  %s201_s16 = scalar_lea.vmem %s1221_s3, %s944_s9 }
  0x11   : > { %v1180_v20 = vsub.f32 %v243_v11, %v1157_v14  ;;  %v247_v26 = vsel %vm245_vm1, %v207_v21, 0  ;;  %v281_v27 = vand.u32 4294901760, %v206_v22 }
  0x12   : > { %v318_v23 = vand.u32 4294901760, %v1161_v15  ;;  %v328_v24 = vand.u32 4294901760, %v1164_v16  ;;  %v338_v25 = vand.u32 4294901760, %v1167_v17  ;;  %219 = vperm.xlu0 %1066, %v209_v18   ;;  %229 = vperm.xlu1 %1067, %v211_v19   ;;  %v278_v29 = vand.u32 4294901760, %v247_v26 }
  0x13   : > { %v348_v28 = vand.u32 4294901760, %v1180_v20  ;;  %v393_v33 = vsub.f32 %v206_v22, %v281_v27 }
  0x14   : > { %v319_v30 = vsub.f32 %v1161_v15, %v318_v23  ;;  %v329_v31 = vsub.f32 %v1164_v16, %v328_v24  ;;  %v339_v32 = vsub.f32 %v1167_v17, %v338_v25  ;;  %981 = vmatprep.subr.mxu0 %v278_v29  ;;  %v386_v36 = vsub.f32 %v247_v26, %v278_v29 }
  0x15   : > { %v349_v37 = vsub.f32 %v1180_v20, %v348_v28  ;;  %982 = vmatpush3.msra.mxu0 %v278_v29  ;;  %v394_v39 = vand.u32 4294901760, %v393_v33 }
  0x16   : > { %v320_v34 = vand.u32 4294901760, %v319_v30  ;;  %v330_v35 = vand.u32 4294901760, %v329_v31  ;;  %v340_v38 = vand.u32 4294901760, %v339_v32  ;;  %983 = vmatprep.subr.mxu0 %v281_v27  ;;  %v387_v40 = vand.u32 4294901760, %v386_v36 }
  0x17   : > { %984 = vmatpush3.msra.mxu0 %v281_v27  ;;  %v395_v41 = vsub.f32 %v393_v33, %v394_v39  ;;  %v350_v43 = vand.u32 4294901760, %v349_v37 }
  0x18   : > { %985 = vmatprep.mubr.f32.mxu0 %v320_v34  ;;  %v388_v42 = vsub.f32 %v386_v36, %v387_v40  ;;  %1001 = vmatprep.subr.mxu0 %v386_v36 }
  0x19   : > { %986 = vmatmul.mubr.f32.vlgmr.msra.gmra.mxu0 %v330_v35  ;;  %v396_v45 = vand.u32 4294901760, %v395_v41 }
  0x1a   : > { %988 = vmatprep.mubr.f32.mxu0 %v340_v38  ;;  %1002 = vmatpush3.msra.mxu0 %v386_v36  ;;  %v389_v44 = vand.u32 4294901760, %v388_v42 }
  0x1b   : > { %1003 = vmatprep.subr.mxu0 %v393_v33 }
  0x1c   : > { %1004 = vmatpush3.msra.mxu0 %v393_v33  ;;  %991 = vmatprep.subr.mxu1 %v389_v44 }
  0x1d   : > { %989 = vmatmul.mubr.f32.gmra.mxu0 %v350_v43  ;;  %992 = vmatpush3.msra.mxu1 %v389_v44 }
  0x1e   : > { %1005 = vmatprep.mubr.f32.mxu0 %v1161_v15  ;;  %993 = vmatprep.subr.mxu1 %v396_v45 }
  0x1f   : > { %1021 = vmatprep.subr.mxu0 %v387_v40  ;;  %994 = vmatpush3.msra.mxu1 %v396_v45 }
  0x20   : > { %996 = vmatmul.mubr.f32.vlgmr.msra.gmra.mxu1 %v1150_v9  ;;  %1011 = vmatprep.subr.mxu1 %v278_v29 }
  0x21   : > { %1012 = vmatpush3.msra.mxu1 %v278_v29  ;;  %1006 = vmatmul.mubr.f32.vlgmr.msra.gmra.mxu0 %v1164_v16 }
  0x22   : > { %998 = vmatprep.mubr.f32.mxu1 %v1152_v10  ;;  %1013 = vmatprep.subr.mxu1 %v281_v27 }
  0x23   : > { %1008 = vmatprep.mubr.f32.mxu0 %v1167_v17  ;;  %1014 = vmatpush3.msra.mxu1 %v281_v27 }
  0x24   : > { %999 = vmatmul.mubr.f32.gmra.mxu1 %v1157_v14  ;;  %1022 = vmatpush3.msra.mxu0 %v387_v40 }
  0x25   : > { %1009 = vmatmul.mubr.f32.gmra.mxu0 %v1180_v20  ;;  %1015 = vmatprep.mubr.f32.mxu1 %v318_v23 }
  0x26   : > { %1023 = vmatprep.subr.mxu0 %v394_v39  ;;  %1031 = vmatprep.subr.mxu1 %v278_v29 }
  0x27   : > { %1024 = vmatpush3.msra.mxu0 %v394_v39  ;;  %1025 = vmatprep.mubr.f32.mxu0 %v1148_v8 }
  0x28   : > { %1016 = vmatmul.mubr.f32.vlgmr.msra.gmra.mxu1 %v328_v24 }
  0x29   : > { %1032 = vmatpush3.msra.mxu1 %v278_v29  ;;  %1026 = vmatmul.mubr.f32.vlgmr.msra.gmra.mxu0 %v1150_v9 }
  0x2a   : > { %1018 = vmatprep.mubr.f32.mxu1 %v338_v25  ;;  %1033 = vmatprep.subr.mxu1 %v281_v27 }
  0x2b   : > { %1028 = vmatprep.mubr.f32.mxu0 %v1152_v10  ;;  %1034 = vmatpush3.msra.mxu1 %v281_v27 }
  0x2c   : > { %1019 = vmatmul.mubr.f32.gmra.mxu1 %v348_v28 }
  0x2d   : > { %1029 = vmatmul.mubr.f32.gmra.mxu0 %v1157_v14  ;;  %1035 = vmatprep.mubr.f32.mxu1 %v1148_v8 }
  0x30   : > { %1036 = vmatmul.mubr.f32.vlgmr.msra.gmra.mxu1 %v1150_v9 }
  0x31   : > { %1038 = vmatprep.mubr.f32.mxu1 %v1152_v10 }
  0x34   : > { %1039 = vmatmul.mubr.f32.gmra.mxu1 %v1157_v14 }
  0x89   : > { %v215_v47 = vpop.permute.xlu0 %214  ;;  %v225_v50 = vpop.permute.xlu1 %224 }
  0x8d   : > { %v220_v51 = vpop.permute.xlu0 %219  ;;  %v230_v57 = vpop.permute.xlu1 %229 }
  0xd9   : > { %v987_v46 = vpop.f32.mrf.mxu0 }
  0xda   : > { %v333_v54 = vadd.f32 %v987_v46, %v220_v51 }
  0xdb   : > { %v322_v48 = vpop.f32.mrf.mxu0 }
  0xdc   : > { %v323_v60 = vadd.f32 %v322_v48, %v215_v47 }
  0xdd   : > { %v990_v49 = vpop.f32.mrf.mxu0 }
  0xde   : > { %v353_v62 = vadd.f32 %v990_v49, %v230_v57 }
  0xdf   : > { %v342_v52 = vpop.f32.mrf.mxu0 }
  0xe0   : > { %v997_v53 = vpop.f32.mrf.mxu1  ;;  %v343_v4 = vadd.f32 %v342_v52, %v225_v50 }
  0xe1   : > { %v1007_v55 = vpop.f32.mrf.mxu0  ;;  %v440_v61 = vadd.f32 %v997_v53, %v333_v54 }
  0xe2   : > { %v433_v56 = vpop.f32.mrf.mxu1 }
  0xe3   : > { %v527_v58 = vpop.f32.mrf.mxu0  ;;  %v434_v1 = vadd.f32 %v433_v56, %v323_v60  ;;  %v535_v5 = vadd.f32 %v1007_v55, %v440_v61 }
  0xe4   : > { %v1000_v59 = vpop.f32.mrf.mxu1 }
  0xe5   : > { %v1010_v63 = vpop.f32.mrf.mxu0  ;;  %v452_v6 = vadd.f32 %v1000_v59, %v353_v62  ;;  %v528_v9 = vadd.f32 %v527_v58, %v434_v1 }
  0xe6   : > { %v445_v0 = vpop.f32.mrf.mxu1 }
  0xe7   : > { %v541_v2 = vpop.f32.mrf.mxu0  ;;  %v446_v10 = vadd.f32 %v445_v0, %v343_v4  ;;  %v549_v14 = vadd.f32 %v1010_v63, %v452_v6 }
  0xe8   : > { %v1017_v3 = vpop.f32.mrf.mxu1 }
  0xe9   : > { %v1027_v7 = vpop.f32.mrf.mxu0  ;;  %v632_v11 = vadd.f32 %v1017_v3, %v535_v5  ;;  %v542_v18 = vadd.f32 %v541_v2, %v446_v10 }
  0xea   : > { %v623_v8 = vpop.f32.mrf.mxu1 }
  0xeb   : > { %v724_v12 = vpop.f32.mrf.mxu0  ;;  %v624_v15 = vadd.f32 %v623_v8, %v528_v9  ;;  %v731_v19 = vadd.f32 %v1027_v7, %v632_v11 }
  0xec   : > { %v1020_v13 = vpop.f32.mrf.mxu1 }
  0xed   : > { %v1030_v17 = vpop.f32.mrf.mxu0  ;;  %v648_v20 = vadd.f32 %v1020_v13, %v549_v14  ;;  %v725_v22 = vadd.f32 %v724_v12, %v624_v15 }
  0xee   : > { %v639_v16 = vpop.f32.mrf.mxu1 }
  0xef   : > { %v640_v23 = vadd.f32 %v639_v16, %v542_v18  ;;  %v736_v25 = vpop.f32.mrf.mxu0  ;;  %v743_v27 = vadd.f32 %v1030_v17, %v648_v20 }
  0xf0   : > { %v1037_v21 = vpop.f32.mrf.mxu1 }
  0xf1   : > { %v822_v24 = vadd.f32 %v1037_v21, %v731_v19  ;;  %v737_v31 = vadd.f32 %v736_v25, %v640_v23 }
  0xf2   : > { %v815_v26 = vpop.f32.mrf.mxu1 }
  0xf3   : > { %v838_v28 = vmax.f32 %v822_v24, 0.0  ;;  %v816_v29 = vadd.f32 %v815_v26, %v725_v22 }
  0xf4   : > { %v1040_v30 = vpop.f32.mrf.mxu1 }
  0xf5   : > { %v842_v32 = vmin.f32 %v838_v28, 6.0  ;;  %v837_v33 = vmax.f32 %v816_v29, 0.0  ;;  %v834_v34 = vadd.f32 %v1040_v30, %v743_v27 }
  0xf6   : > { %v827_v35 = vpop.f32.mrf.mxu1 }
  0xf7   : > { %846 = vst [vmem:[%s201_s16 + $0x8] sm:$0xff] %v842_v32  ;;  %v841_v36 = vmin.f32 %v837_v33, 6.0  ;;  %v840_v37 = vmax.f32 %v834_v34, 0.0  ;;  %v828_v38 = vadd.f32 %v827_v35, %v737_v31 }
  0xf9   : > { %845 = vst [vmem:[%s201_s16] sm:$0xff] %v841_v36  ;;  %v844_v39 = vmin.f32 %v840_v37, 6.0  ;;  %v839_v40 = vmax.f32 %v828_v38, 0.0 }
  0xfb   : > { %848 = vst [vmem:[%s201_s16 + $0x18] sm:$0xff] %v844_v39  ;;  %v843_v41 = vmin.f32 %v839_v40, 6.0 }
  0xfd   : > { %847 = vst [vmem:[%s201_s16 + $0x10] sm:$0xff] %v843_v41 }
  0xfe PF: > { %s13_s14 = sadd.s32 1, %s1090_s14   ;;  %s1222_s12 = smov %s1086_s13 }
  0xff   : > { %p10_p5 = scmp.ge.s32.totalorder %s13_s14, 4   ;;  %s1223_s13 = smov %s1225_s15 }
 0x101   :  { %12 = sbr.rel (!%p10_p5) target bundleno = 2 (0x2), region = 62 }

</bundles_post_ra>
